<compile_context>
chip_gen: v7x
topology: tpu7x:2x2x1
jax: 0.10.0
libtpu: 0.0.40
codegen_flags: <defaults>
</compile_context>

<pallas_src>
import functools

import jax
import jax.numpy as jnp
from jax.experimental import pallas as pl
from jax.experimental.pallas import tpu as pltpu

EPS = 1e-5


# ----------------------------------------------------------------------------
# Fused kernel: whole sequence (and TB batch elements) resident per grid step.
# ----------------------------------------------------------------------------
def my_layernorm_kernel(x_ref, gamma_ref, beta_ref, o_ref):
    # x_ref: (TB, L, C); gamma_ref / beta_ref: (1, C).
    x = x_ref[...].astype(jnp.float32)

    # LayerNorm over channels (biased variance, eps inside rsqrt — matches
    # torch.nn.LayerNorm).
    mean = jnp.mean(x, axis=-1, keepdims=True)
    centered = x - mean
    var = jnp.mean(centered * centered, axis=-1, keepdims=True)
    x_hat = centered * jax.lax.rsqrt(var + EPS) * gamma_ref[...] + beta_ref[...]

    # Subtract the per-batch mean of x_hat over the sequence axis (dim=1).
    bias = jnp.mean(x_hat, axis=1, keepdims=True)
    o_ref[...] = (x_hat - bias).astype(o_ref.dtype)


# ----------------------------------------------------------------------------
# Two-pass fallback for long sequences (full-L block would not fit VMEM).
# ----------------------------------------------------------------------------
def _ln_sum_kernel(x_ref, gamma_ref, beta_ref, xhat_ref, sum_ref):
    # x_ref / xhat_ref: (1, TL, C); sum_ref: (1, 1, C) f32 accumulator that
    # stays resident across the "arbitrary" L grid axis.
    x = x_ref[...].astype(jnp.float32)
    mean = jnp.mean(x, axis=-1, keepdims=True)
    centered = x - mean
    var = jnp.mean(centered * centered, axis=-1, keepdims=True)
    x_hat = centered * jax.lax.rsqrt(var + EPS) * gamma_ref[...] + beta_ref[...]
    xhat_ref[...] = x_hat.astype(xhat_ref.dtype)

    @pl.when(pl.program_id(1) == 0)
    def _():
        sum_ref[...] = jnp.zeros_like(sum_ref)

    sum_ref[...] += jnp.sum(x_hat, axis=1, keepdims=True)


def _sub_bias_kernel(xhat_ref, sum_ref, o_ref, *, inv_l):
    bias = sum_ref[...] * inv_l  # (1, 1, C) f32
    o_ref[...] = (xhat_ref[...].astype(jnp.float32) - bias).astype(o_ref.dtype)


# ----------------------------------------------------------------------------
# Sizing helpers
# ----------------------------------------------------------------------------
def _tpu_params():
    """Per-generation (vmem_limit_bytes, target_block_bytes, prefer_even_steps)."""
    kind = ""
    try:
        kind = jax.devices()[0].device_kind.lower()
    except Exception:
        pass
    if "v7" in kind or "7x" in kind:
        # 64 MiB physical VMEM per TC, 2 TensorCores: tight budget, even steps.
        return 48 << 20, 4 << 20, True
    if "v5" in kind or "v6" in kind:
        # 128 MiB VMEM, single TensorCore: go for big slabs, one step is fine.
        return 96 << 20, 16 << 20, False
    # Unknown device: conservative defaults.
    return 32 << 20, 4 << 20, False


def _fused_vmem_bytes(tb, l, c, itemsize):
    blk_in = tb * l * c * itemsize
    blk_f32 = tb * l * c * 4
    # 2x double-buffered input + 2x double-buffered output (input dtype)
    # + ~3 block-sized f32 temporaries (x_f32 / centered / x_hat).
    return 4 * blk_in + 3 * blk_f32


def _choose_tb(B, L, C, itemsize, *, target_bytes, vmem_budget, prefer_even_steps):
    """Largest batch tile TB (divisor of B) whose fused block fits the VMEM
    budget; stop growing past `target_bytes` once a candidate exists.  On v7x,
    prefer a TB that gives an even grid-step count so both TCs split evenly."""
    per_b = L * C * itemsize
    cands = []
    for tb in range(1, B + 1):
        if B % tb:
            continue
        if _fused_vmem_bytes(tb, L, C, itemsize) > vmem_budget:
            continue
        if cands and tb * per_b > target_bytes:
            continue
        cands.append(tb)
    if not cands:
        return None
    if prefer_even_steps:
        even = [tb for tb in cands if (B // tb) % 2 == 0]
        if even:
            return max(even)
    return max(cands)


def _choose_tl(L, C, itemsize, *, vmem_budget):
    """Largest sequence tile TL (multiple of 8 dividing L) whose per-step block
    fits the budget; fall back to the smallest legal tile (8)."""
    best = None
    for tl in range(8, L + 1, 8):
        if L % tl:
            continue
        if _fused_vmem_bytes(1, tl, C, itemsize) <= vmem_budget:
            best = tl
    if best is None and L >= 8 and L % 8 == 0:
        best = 8
    return best


# ----------------------------------------------------------------------------
# Wrappers
# ----------------------------------------------------------------------------
def _my_layernorm_two_pass(x, gamma2d, beta2d, TL, vmem_limit):
    B, L, C = x.shape
    grid = (B, L // TL)

    xhat, seq_sum = pl.pallas_call(
        _ln_sum_kernel,
        out_shape=(
            jax.ShapeDtypeStruct((B, L, C), x.dtype),
            jax.ShapeDtypeStruct((B, 1, C), jnp.float32),
        ),
        grid_spec=pltpu.PrefetchScalarGridSpec(
            num_scalar_prefetch=0,
            grid=grid,
            in_specs=[
                pl.BlockSpec((1, TL, C), lambda b, l: (b, l, 0)),
                pl.BlockSpec((1, C), lambda b, l: (0, 0)),
                pl.BlockSpec((1, C), lambda b, l: (0, 0)),
            ],
            out_specs=[
                pl.BlockSpec((1, TL, C), lambda b, l: (b, l, 0)),
                pl.BlockSpec((1, 1, C), lambda b, l: (b, 0, 0)),
            ],
        ),
        compiler_params=pltpu.CompilerParams(
            dimension_semantics=("parallel", "arbitrary"),
            vmem_limit_bytes=vmem_limit,
        ),
    )(x, gamma2d, beta2d)

    return pl.pallas_call(
        functools.partial(_sub_bias_kernel, inv_l=1.0 / L),
        out_shape=jax.ShapeDtypeStruct((B, L, C), x.dtype),
        grid_spec=pltpu.PrefetchScalarGridSpec(
            num_scalar_prefetch=0,
            grid=grid,
            in_specs=[
                pl.BlockSpec((1, TL, C), lambda b, l: (b, l, 0)),
                pl.BlockSpec((1, 1, C), lambda b, l: (b, 0, 0)),
            ],
            out_specs=pl.BlockSpec((1, TL, C), lambda b, l: (b, l, 0)),
        ),
        compiler_params=pltpu.CompilerParams(
            dimension_semantics=("parallel", "parallel"),
            vmem_limit_bytes=vmem_limit,
        ),
    )(xhat, seq_sum)


def my_layernorm(x, gamma, beta, *, max_block_bytes=None):
    """x: (B, L, C); gamma, beta: (C,). Returns (B, L, C)."""
    B, L, C = x.shape
    itemsize = jnp.dtype(x.dtype).itemsize
    vmem_limit, target_bytes, prefer_even = _tpu_params()

    # `max_block_bytes` only constrains the block-size *choice* (used by the
    # test below to exercise the long-sequence fallback); the compiler VMEM
    # limit always reflects the real chip budget.
    choice_budget = vmem_limit if max_block_bytes is None else min(vmem_limit, max_block_bytes)
    choice_target = target_bytes if max_block_bytes is None else min(target_bytes, max_block_bytes)

    gamma2d = jnp.asarray(gamma).reshape(1, C)
    beta2d = jnp.asarray(beta).reshape(1, C)

    TB = _choose_tb(B, L, C, itemsize, target_bytes=choice_target,
                    vmem_budget=choice_budget, prefer_even_steps=prefer_even)

    if TB is None:
        # Even a single-batch (1, L, C) block blows the VMEM budget: tile the
        # sequence axis with a two-pass kernel instead.
        TL = _choose_tl(L, C, itemsize, vmem_budget=choice_budget)
        if TL is not None:
            return _my_layernorm_two_pass(x, gamma2d, beta2d, TL, vmem_limit)
        # TODO(synk): L is not tileable in multiples of 8; fall back to one
        # full-L block per batch element and accept the VMEM pressure.
        TB = 1

    assert B % TB == 0, "TB must evenly divide the batch dimension"
    steps = B // TB

    x_spec = pl.BlockSpec((TB, L, C), lambda b: (b, 0, 0))
    if steps >= 8 and TB * L * C * itemsize < (1 << 20):
        # Many short steps with small blocks: deepen input pipelining to hide
        # DMA issue latency behind the very short per-step compute.
        x_spec = pl.BlockSpec((TB, L, C), lambda b: (b, 0, 0),
                              pipeline_mode=pl.Buffered(3))

    return pl.pallas_call(
        my_layernorm_kernel,
        out_shape=jax.ShapeDtypeStruct((B, L, C), x.dtype),
        grid_spec=pltpu.PrefetchScalarGridSpec(
            num_scalar_prefetch=0,
            grid=(steps,),
            in_specs=[
                x_spec,
                pl.BlockSpec((1, C), lambda b: (0, 0)),
                pl.BlockSpec((1, C), lambda b: (0, 0)),
            ],
            out_specs=pl.BlockSpec((TB, L, C), lambda b: (b, 0, 0)),
        ),
        compiler_params=pltpu.CompilerParams(
            dimension_semantics=("parallel",),
            vmem_limit_bytes=vmem_limit,
        ),
    )(x, gamma2d, beta2d)


def my_layernorm_ref(x, gamma, beta):
    """Pure-JAX reference matching the PyTorch module."""
    xf = x.astype(jnp.float32)
    mean = jnp.mean(xf, axis=-1, keepdims=True)
    var = jnp.mean((xf - mean) ** 2, axis=-1, keepdims=True)
    x_hat = (xf - mean) * jax.lax.rsqrt(var + EPS)
    x_hat = x_hat * gamma + beta
    bias = jnp.mean(x_hat, axis=1, keepdims=True)
    return (x_hat - bias).astype(x.dtype)


if __name__ == "__main__":
    key = jax.random.PRNGKey(0)

    # --- fused path: B=2, L=8, C=32 (batch, seq, channels/hidden) ---
    B, L, C = 2, 8, 32
    x = jax.random.normal(key, (B, L, C), dtype=jnp.float32)
    gamma = jnp.ones((C,), dtype=jnp.float32)   # nn.LayerNorm default weight
    beta = jnp.zeros((C,), dtype=jnp.float32)   # nn.LayerNorm default bias

    out = jax.block_until_ready(my_layernorm(x, gamma, beta))
    ref = my_layernorm_ref(x, gamma, beta)
    assert out.shape == (B, L, C)
    assert jnp.allclose(out, ref, atol=1e-5, rtol=1e-5), "fused path mismatch"

    # --- force the long-sequence (two-pass, L-tiled) fallback at small shape ---
    B2, L2, C2 = 2, 16, 32
    x2 = jax.random.normal(jax.random.PRNGKey(1), (B2, L2, C2), dtype=jnp.float32)
    gamma2 = jax.random.normal(jax.random.PRNGKey(2), (C2,), dtype=jnp.float32)
    beta2 = jax.random.normal(jax.random.PRNGKey(3), (C2,), dtype=jnp.float32)
    out2 = jax.block_until_ready(
        my_layernorm(x2, gamma2, beta2, max_block_bytes=1024))
    ref2 = my_layernorm_ref(x2, gamma2, beta2)
    assert out2.shape == (B2, L2, C2)
    assert jnp.allclose(out2, ref2, atol=1e-5, rtol=1e-5), "two-pass path mismatch"

    print("KERNEL_OK")
</pallas_src>

<mosaic_0001>
module attributes {stable_mosaic.version = 11 : i64} {
  func.func @my_layernorm_kernel(%arg0: i32, %arg1: memref<2x8x32xf32, #tpu.memory_space<vmem>>, %arg2: memref<1x32xf32, #tpu.memory_space<vmem>>, %arg3: memref<1x32xf32, #tpu.memory_space<vmem>>, %arg4: memref<2x8x32xf32, #tpu.memory_space<vmem>>) attributes {dimension_semantics = [#tpu.dimension_semantics<parallel>], iteration_bounds = array<i64: 1>, scalar_prefetch = 0 : i64, scratch_operands = 0 : i64, tpu.core_type = #tpu.core_type<tc>, window_params = [{transform_indices = @transform_0, window_bounds = array<i64: 2, 8, 32>}, {pipeline_mode = #tpu.pipeline_mode<synchronous>, transform_indices = @transform_1, window_bounds = array<i64: 1, 32>}, {pipeline_mode = #tpu.pipeline_mode<synchronous>, transform_indices = @transform_2, window_bounds = array<i64: 1, 32>}, {transform_indices = @transform_3, window_bounds = array<i64: 2, 8, 32>}]} {
    %c0 = arith.constant 0 : index
    %c0_0 = arith.constant 0 : index
    %c0_1 = arith.constant 0 : index
    %0 = vector.load %arg1[%c0, %c0_0, %c0_1] : memref<2x8x32xf32, #tpu.memory_space<vmem>>, vector<2x8x32xf32>
    %cst = arith.constant dense<0.000000e+00> : vector<2x8xf32>
    %1 = vector.multi_reduction <add>, %0, %cst [2] : vector<2x8x32xf32> to vector<2x8xf32>
    %2 = vector.shape_cast %1 : vector<2x8xf32> to vector<2x8x1xf32>
    %cst_2 = arith.constant 3.200000e+01 : f32
    %3 = vector.broadcast %cst_2 : f32 to vector<2x8x1xf32>
    %4 = arith.divf %2, %3 : vector<2x8x1xf32>
    %5 = vector.broadcast %4 : vector<2x8x1xf32> to vector<2x8x32xf32>
    %6 = arith.subf %0, %5 : vector<2x8x32xf32>
    %7 = arith.mulf %6, %6 : vector<2x8x32xf32>
    %cst_3 = arith.constant dense<0.000000e+00> : vector<2x8xf32>
    %8 = vector.multi_reduction <add>, %7, %cst_3 [2] : vector<2x8x32xf32> to vector<2x8xf32>
    %9 = vector.shape_cast %8 : vector<2x8xf32> to vector<2x8x1xf32>
    %cst_4 = arith.constant 3.200000e+01 : f32
    %10 = vector.broadcast %cst_4 : f32 to vector<2x8x1xf32>
    %11 = arith.divf %9, %10 : vector<2x8x1xf32>
    %cst_5 = arith.constant 9.99999974E-6 : f32
    %12 = vector.broadcast %cst_5 : f32 to vector<2x8x1xf32>
    %13 = arith.addf %11, %12 : vector<2x8x1xf32>
    %14 = math.rsqrt %13 : vector<2x8x1xf32>
    %15 = vector.broadcast %14 : vector<2x8x1xf32> to vector<2x8x32xf32>
    %16 = arith.mulf %6, %15 : vector<2x8x32xf32>
    %c0_6 = arith.constant 0 : index
    %c0_7 = arith.constant 0 : index
    %17 = vector.load %arg2[%c0_6, %c0_7] : memref<1x32xf32, #tpu.memory_space<vmem>>, vector<1x32xf32>
    %18 = vector.shape_cast %17 : vector<1x32xf32> to vector<1x1x32xf32>
    %19 = vector.broadcast %18 : vector<1x1x32xf32> to vector<2x8x32xf32>
    %20 = arith.mulf %16, %19 : vector<2x8x32xf32>
    %c0_8 = arith.constant 0 : index
    %c0_9 = arith.constant 0 : index
    %21 = vector.load %arg3[%c0_8, %c0_9] : memref<1x32xf32, #tpu.memory_space<vmem>>, vector<1x32xf32>
    %22 = vector.shape_cast %21 : vector<1x32xf32> to vector<1x1x32xf32>
    %23 = vector.broadcast %22 : vector<1x1x32xf32> to vector<2x8x32xf32>
    %24 = arith.addf %20, %23 : vector<2x8x32xf32>
    %cst_10 = arith.constant dense<0.000000e+00> : vector<2x32xf32>
    %25 = vector.multi_reduction <add>, %24, %cst_10 [1] : vector<2x8x32xf32> to vector<2x32xf32>
    %26 = vector.shape_cast %25 : vector<2x32xf32> to vector<2x1x32xf32>
    %cst_11 = arith.constant 8.000000e+00 : f32
    %27 = vector.broadcast %cst_11 : f32 to vector<2x1x32xf32>
    %28 = arith.divf %26, %27 : vector<2x1x32xf32>
    %29 = vector.broadcast %28 : vector<2x1x32xf32> to vector<2x8x32xf32>
    %30 = arith.subf %24, %29 : vector<2x8x32xf32>
    %c0_12 = arith.constant 0 : index
    %c0_13 = arith.constant 0 : index
    %c0_14 = arith.constant 0 : index
    %31 = vector.load %arg4[%c0_12, %c0_13, %c0_14] : memref<2x8x32xf32, #tpu.memory_space<vmem>>, vector<2x8x32xf32>
    tpu.vector_store %arg4[%c0_12, %c0_13, %c0_14], %30 {strides = array<i32>} : memref<2x8x32xf32, #tpu.memory_space<vmem>>, vector<2x8x32xf32>,
    return
  }
  func.func @transform_0(%arg0: i32) -> (i32, i32, i32) {
    %c0_i32 = arith.constant 0 : i32
    %c0_i32_0 = arith.constant 0 : i32
    %c0_i32_1 = arith.constant 0 : i32
    return %arg0, %c0_i32, %c0_i32_0 : i32, i32, i32
  }
  func.func @transform_1(%arg0: i32) -> (i32, i32) {
    %c0_i32 = arith.constant 0 : i32
    %c0_i32_0 = arith.constant 0 : i32
    %c0_i32_1 = arith.constant 0 : i32
    return %c0_i32, %c0_i32_0 : i32, i32
  }
  func.func @transform_2(%arg0: i32) -> (i32, i32) {
    %c0_i32 = arith.constant 0 : i32
    %c0_i32_0 = arith.constant 0 : i32
    %c0_i32_1 = arith.constant 0 : i32
    return %c0_i32, %c0_i32_0 : i32, i32
  }
  func.func @transform_3(%arg0: i32) -> (i32, i32, i32) {
    %c0_i32 = arith.constant 0 : i32
    %c0_i32_0 = arith.constant 0 : i32
    %c0_i32_1 = arith.constant 0 : i32
    return %arg0, %c0_i32, %c0_i32_0 : i32, i32, i32
  }
}

</mosaic_0001>

<bundles_post_ra>
// kernel: tpu_custom_call.1
= control target key start
LH: loop header
LB: loop body
LE: loop exit
PB: predicated region body
PF: predicated region fallthrough
CT: control target
= control target key end

     0   :  { %8 = vsyncpa [#allocation3], 0  ;;  %s241_s0 = inlined_call_operand.hbm [shape: f32[2,8,32], index: 0, kind: input, shape index: {}]   ;;  %s242_s1 = inlined_call_operand.vmem [shape: f32[1,32], index: 1, kind: input, shape index: {}]   ;;  %s243_s2 = inlined_call_operand.vmem [shape: f32[1,32], index: 2, kind: input, shape index: {}]   ;;  %s244_s3 = inlined_call_operand.hbm [shape: f32[2,8,32], index: 3, kind: output, shape index: {}]  }
   0x1   :  { %9 = vsyncpa [#allocation4], 0  ;;  %s173_s12 = smov [#allocation2]   ;;  %s125_s16 = scalar_lea.hbm %s241_s0, 256 }
   0x2   :  { %s15_s13 = sshll.u32 %s173_s12, 4  ;;  %p126_p0 = scmp.ne.s32.totalorder %s241_s0, %s125_s16  ;;  %s16_s13 = int_to_ptr.vmem [resolvable:$true] %s15_s13 }
   0x3   :  { %p129_p1 = scmp.lt.u32.totalorder %s125_s16, %s241_s0 }
   0x5   :  { %p131_p2 = pnand %p129_p1, %p126_p0 }
   0x7   :  { %134 = shalt.err (!%p131_p2)
}
   0x8   :  { %s135_s21 = scalar_lea.vmem %s16_s13, 256  ;;  %p140_p4 = scmp.lt.s32.totalorder %s16_s13, %s16_s13 }
   0x9   :  { %p136_p3 = scmp.ne.s32.totalorder %s16_s13, %s135_s21  ;;  %p141_p5 = scmp.lt.s32.totalorder %s135_s21, %s135_s21 }
   0xb   :  { %p142_p6 = por %p141_p5, %p140_p4 }
   0xd   :  { %p143_p7 = pnand %p142_p6, %p136_p3 }
   0xf   :  { %146 = shalt.err (!%p143_p7)
}
  0x10   :  { %s174_s22 = smov 128   ;;  %s175_s23 = smov 8  }
  0x11   :  { %21 = dma.hbm_to_vmem [thread:$0]  %s241_s0, 256, %s16_s13, [#allocation3], %s174_s22, %s174_s22, %s175_s23  }
  0x12   :  { %169 = dma.done.wait [#allocation3], 256  }
  0x13   :  { %170 = vsyncadd [#allocation3], 4294967040  ;;  %vm31_vm0 = vcmask 261120   ;;  %v29_v0 = vld [vmem:[#allocation2] sm:$0xff]  ;;  %v30_v1 = vld [vmem:[#allocation2 + $0x8] sm:$0xff] }
  0x14   :  { %v32_v2 = vsel %vm31_vm0, %v29_v0, 0.0  ;;  %v35_v3 = vsel %vm31_vm0, %v30_v1, 0.0  ;;  %v115_v21 = vld [vmem:[%s242_s1] ss:$0 sm:$0xff]  ;;  %s176_s1 = smov [#allocation5]  }
  0x15   :  { %33 = vadd.xlane.f32.xlu0 %v32_v2  ;;  %v116_v23 = vld [vmem:[%s243_s2] ss:$0 sm:$0xff]  ;;  %s103_s2 = sshll.u32 %s176_s1, 4  ;;  %s104_s2 = int_to_ptr.vmem [resolvable:$true] %s103_s2 }
  0x16   :  { %s147_s29 = scalar_lea.vmem %s104_s2, 256  ;;  %p152_p9 = scmp.lt.s32.totalorder %s104_s2, %s104_s2 }
  0x17   :  { %p148_p8 = scmp.ne.s32.totalorder %s104_s2, %s147_s29  ;;  %p153_p10 = scmp.lt.s32.totalorder %s147_s29, %s147_s29 }
  0x19   :  { %36 = vadd.xlane.f32.xlu0 %v35_v3  ;;  %p154_p11 = por %p153_p10, %p152_p9 }
  0x1b   :  { %p155_p12 = pnand %p154_p11, %p148_p8 }
  0xa2   :  { %v34_v4 = vpop.xlane.xlu0 %33 }
  0xa3   :  { %v39_v5 = vmul.f32 0.03125, %v34_v4 }
  0xa5   :  { %v41_v6 = vsub.f32 %v29_v0, %v39_v5 }
  0xa6   :  { %v37_v7 = vpop.xlane.xlu0 %36 }
  0xa7   :  { %v40_v8 = vmul.f32 0.03125, %v37_v7  ;;  %v43_v9 = vmul.f32 %v41_v6, %v41_v6 }
  0xa9   :  { %v42_v10 = vsub.f32 %v30_v1, %v40_v8  ;;  %v45_v11 = vsel %vm31_vm0, %v43_v9, 0.0 }
  0xaa   :  { %46 = vadd.xlane.f32.xlu1 %v45_v11 }
  0xab   :  { %v44_v12 = vmul.f32 %v42_v10, %v42_v10 }
  0xad   :  { %v48_v13 = vsel %vm31_vm0, %v44_v12, 0.0 }
  0xae   :  { %49 = vadd.xlane.f32.xlu1 %v48_v13 }
 0x137   :  { %v47_v14 = vpop.xlane.xlu1 %46 }
 0x138   :  { %v51_v15 = vmul.f32 0.03125, %v47_v14 }
 0x13a   :  { %v53_v16 = vadd.f32 1e-05, %v51_v15 }
 0x13b   :  { %v50_v17 = vpop.xlane.xlu1 %49 }
 0x13c   :  { %121 = vrsqrt.f32 %v53_v16  ;;  %v52_v18 = vmul.f32 0.03125, %v50_v17 }
 0x13e   :  { %v54_v19 = vadd.f32 1e-05, %v52_v18 }
 0x140   :  { %123 = vrsqrt.f32 %v54_v19 }
 0x146   :  { %v122_v20 = vpop.eup %121 }
 0x147   :  { %v57_v22 = vmul.f32 %v122_v20, %v41_v6 }
 0x149   :  { %v66_v24 = vmul.f32 %v115_v21, %v57_v22 }
 0x14a   :  { %v124_v25 = vpop.eup %123 }
 0x14b   :  { %v58_v26 = vmul.f32 %v124_v25, %v42_v10  ;;  %v75_v27 = vadd.f32 %v116_v23, %v66_v24 }
 0x14d   :  { %v67_v28 = vmul.f32 %v115_v21, %v58_v26  ;;  %v77_v29 = vsel %vm31_vm0, %v75_v27, 0.0 }
 0x14e   :  { %v78_v30 = vrot.slane %v77_v29, 4 }
 0x14f   :  { %v76_v31 = vadd.f32 %v116_v23, %v67_v28 }
 0x150   :  { %v79_v32 = vadd.f32 %v78_v30, %v77_v29 }
 0x151   :  { %v84_v33 = vsel %vm31_vm0, %v76_v31, 0.0 }
 0x152   :  { %v80_v34 = vrot.slane %v79_v32, 2  ;;  %v85_v35 = vrot.slane %v84_v33, 4 }
 0x154   :  { %v81_v36 = vadd.f32 %v80_v34, %v79_v32  ;;  %v86_v37 = vadd.f32 %v85_v35, %v84_v33 }
 0x156   :  { %v82_v38 = vrot.slane %v81_v36, 1  ;;  %v87_v39 = vrot.slane %v86_v37, 2 }
 0x158   :  { %v83_v40 = vadd.f32 %v82_v38, %v81_v36  ;;  %v88_v41 = vadd.f32 %v87_v39, %v86_v37 }
 0x15a   :  { %v89_v42 = vrot.slane %v88_v41, 1  ;;  %v92_v43 = vmul.f32 0.125, %v83_v40 }
 0x15c   :  { %v90_v44 = vadd.f32 %v89_v42, %v88_v41  ;;  %v94_v45 = vsub.f32 %v75_v27, %v92_v43 }
 0x15e   :  { %v93_v46 = vmul.f32 0.125, %v90_v44  ;;  %96 = vst.msk [vmem:[#allocation5] sm:$0xff] %vm31_vm0, %v94_v45 }
 0x160   :  { %v95_v47 = vsub.f32 %v76_v31, %v93_v46 }
 0x162   :  { %97 = vst.msk [vmem:[#allocation5 + $0x8] sm:$0xff] %vm31_vm0, %v95_v47 }
 0x163   :  { %158 = shalt.err (!%p155_p12)
}
 0x164   :  { %s159_s5 = scalar_lea.hbm %s244_s3, 256 }
 0x165   :  { %p160_p13 = scmp.ne.s32.totalorder %s244_s3, %s159_s5  ;;  %p163_p0 = scmp.lt.u32.totalorder %s159_s5, %s244_s3 }
 0x167   :  { %p165_p1 = pnand %p163_p0, %p160_p13 }
 0x169   :  { %168 = shalt.err (!%p165_p1)
}
 0x16a   :  { %109 = dma.vmem_to_hbm [thread:$0]  %s104_s2, 256, %s244_s3, [#allocation4], %s174_s22, %s174_s22, %s175_s23  }
 0x16b   :  { %171 = dma.done.wait [#allocation4], 256  }
 0x16c   :  { %172 = vsyncadd [#allocation4], 4294967040 }
 0x16d   :  { %113 = vsyncpa [#allocation3], 1 }
 0x16e   :  { %114 = vsyncpa [#allocation4], 1 }

</bundles_post_ra>
